<compile_context>
chip_gen: v7x
topology: tpu7x:2x2x1
jax: 0.10.0
libtpu: 0.0.40
codegen_flags: <defaults>
</compile_context>

<pallas_src>
import math

import jax
import jax.numpy as jnp
from jax import lax
from jax.experimental import pallas as pl
from jax.experimental.pallas import tpu as pltpu

_INV_SQRT2 = 0.7071067811865476
_SQRT_2_OVER_PI = 0.7978845608028654
_LN_EPS = 1e-5


def _make_kernel(approx_gelu):
    def posmlp_kernel(x_ref, lnw_ref, lnb_ref, w1_ref, b1_ref, posbd_ref,
                      tb_ref, w2_ref, b2_ref, o_ref, mixed_ref):
        rows, C = x_ref.shape                 # rows = W_BLK * N
        gamma = posbd_ref.shape[0]
        V = C // gamma

        x = x_ref[...].astype(jnp.float32)

        # LayerNorm over channels (eps=1e-5, biased variance), f32 math.
        # One-pass statistics: var = E[x^2] - mean^2 (halves XLU reductions).
        mean = jnp.mean(x, axis=-1, keepdims=True)
        ex2 = jnp.mean(x * x, axis=-1, keepdims=True)
        var = ex2 - mean * mean
        xn = (x - mean) * lax.rsqrt(var + _LN_EPS)
        xn = xn * lnw_ref[...] + lnb_ref[...]

        # fc1: C -> 2C for all rows at once (MXU), then GELU.
        w1 = w1_ref[...]
        h = jnp.dot(xn.astype(w1.dtype), w1,
                    preferred_element_type=jnp.float32) + b1_ref[...]
        if approx_gelu:
            # tanh approximation: transcendental runs on the EUP slot.
            h = 0.5 * h * (1.0 + jnp.tanh(
                _SQRT_2_OVER_PI * (h + 0.044715 * h * h * h)))
        else:
            # exact erf to match nn.GELU() defaults.
            h = 0.5 * h * (1.0 + lax.erf(h * _INV_SQRT2))

        # chunk(2, dim=-1).  Channels were permuted in the wrapper so gamma
        # group s occupies the contiguous column range [s*V, (s+1)*V).
        u = h[:, :C]
        v = h[:, C:]

        # Learned positional token mixing: one block-diagonal MXU matmul per
        # gamma group over every window in the block.  Results go straight
        # into the VMEM scratch slab -- no per-window unroll, no concatenates.
        mm_dtype = posbd_ref.dtype
        u_mm = u.astype(mm_dtype)
        for s in range(gamma):                # gamma is small & static
            mixed_ref[:, s * V:(s + 1) * V] = jnp.dot(
                posbd_ref[s], u_mm[:, s * V:(s + 1) * V],
                preferred_element_type=jnp.float32)

        # Token bias added once to the whole block, then gate (u' * v), then
        # fc2: C -> C (dropout p=0.0 is identity).
        g = (mixed_ref[...] + tb_ref[...]) * v
        w2 = w2_ref[...]
        out = jnp.dot(g.astype(w2.dtype), w2,
                      preferred_element_type=jnp.float32) + b2_ref[...]
        o_ref[...] = out.astype(o_ref.dtype)

    return posmlp_kernel


def _pick_windows_per_block(num_windows, win_size, target_rows=256):
    """Windows per grid step.  rows_blk = w_blk*win_size targets ~target_rows
    (the MXU M sweet spot), keeps w_blk*win_size % 8 == 0 (sublane alignment
    for arbitrary win_size), and never collapses below ~half the target just
    to divide the window count exactly -- the wrapper zero-pads instead."""
    base = 8 // math.gcd(win_size, 8)          # w_blk must be a multiple of this
    cap_rows = max(target_rows, base * win_size)
    max_w = max(base, (cap_rows // win_size) // base * base)
    max_w = min(max_w, -(-num_windows // base) * base)   # <= padded window count
    best = max_w
    best_pad = -(-num_windows // max_w) * max_w - num_windows
    for w in range(max_w, max(max_w // 2, base) - 1, -base):
        pad = -(-num_windows // w) * w - num_windows
        if pad < best_pad:
            best, best_pad = w, pad
            if pad == 0:
                break
    return best


def posmlp_layer_t(x, params, *, win_size, gamma,
                   matmul_dtype=jnp.bfloat16, approx_gelu=False,
                   target_rows=256):
    B, Wn, N, C = x.shape
    assert N == win_size
    assert C % gamma == 0
    G = B * Wn
    V = C // gamma

    w_blk = _pick_windows_per_block(G, N, target_rows=target_rows)
    rows_blk = w_blk * N
    G_pad = -(-G // w_blk) * w_blk
    grid = (G_pad // w_blk,)

    ln_w = params["ln_w"].reshape(1, C).astype(jnp.float32)
    ln_b = params["ln_b"].reshape(1, C).astype(jnp.float32)

    # Channel permutation: new channel c' = s*V + v reads old channel v*gamma+s.
    # Applying it to BOTH fc1 output halves and to the fc2 input rows leaves
    # the layer output unchanged, but makes every gamma group a contiguous
    # slice so the in-kernel mixing needs no strided gathers / transposes.
    c_new = jnp.arange(C)
    perm = (c_new % V) * gamma + (c_new // V)
    w1, b1 = params["w1"], params["b1"]
    w1p = jnp.concatenate([w1[:, :C][:, perm], w1[:, C:][:, perm]], axis=1)
    b1p = jnp.concatenate([b1[:C][perm], b1[C:][perm]]).reshape(1, 2 * C)
    b1p = b1p.astype(jnp.float32)
    w2p = params["w2"][perm, :]
    b2 = params["b2"].reshape(1, C).astype(jnp.float32)
    w1p = w1p.astype(matmul_dtype)        # bf16 MXU inputs by default (all gens)
    w2p = w2p.astype(matmul_dtype)

    # posmap from the relative-position bias table (LearnedPosMapT.forward_pos),
    # then block-diagonalized over the w_blk windows of one block:
    #   posbd[s] = I_{w_blk} (x) posmap[s]   of shape (rows_blk, rows_blk).
    table = params["table"]                                       # (2N-1, gamma)
    rel = jnp.arange(N)[:, None] - jnp.arange(N)[None, :] + (N - 1)
    posmap = jnp.transpose(table[rel], (2, 0, 1)).astype(jnp.float32)  # (g,N,N)
    eye = jnp.eye(w_blk, dtype=jnp.float32)
    posbd = jnp.einsum('ij,smn->simjn', eye, posmap).reshape(
        gamma, rows_blk, rows_blk).astype(matmul_dtype)

    # Per-token bias tiled across the windows of one block: (rows_blk, 1).
    token_bias = jnp.tile(params["token_bias"].reshape(N, 1).astype(jnp.float32),
                          (w_blk, 1))

    x_flat = x.reshape(G * N, C)
    if G_pad != G:
        # Zero-pad extra windows; block-diagonal mixing keeps them isolated.
        x_flat = jnp.pad(x_flat, ((0, (G_pad - G) * N), (0, 0)))

    rows_total = G_pad * N
    mm_bytes = jnp.dtype(matmul_dtype).itemsize
    x_bytes = x.dtype.itemsize

    cost = pl.CostEstimate(
        flops=int(2 * rows_total * C * 3 * C            # fc1 + fc2
                  + 2 * rows_total * rows_blk * C),     # block-diag mixing
        transcendentals=int(rows_total * 2 * C),        # advisory (GELU)
        bytes_accessed=int(2 * rows_total * C * x_bytes
                           + (3 * C * C + gamma * rows_blk * rows_blk) * mm_bytes
                           + (6 * C + rows_blk) * 4),
    )

    # VMEM budget from actual buffer sizes (pipeline double-buffers blocks),
    # plus headroom for f32 intermediates; clamp to 64 MiB (v7x physical VMEM).
    step_io = 2 * rows_blk * C * x_bytes                         # x-in + out
    resident = ((C * 2 * C + C * C) * mm_bytes                   # fc1/fc2 weights
                + gamma * rows_blk * rows_blk * mm_bytes         # block-diag posmap
                + (6 * C + rows_blk) * 4)                        # LN/bias/token bias
    scratch = rows_blk * C * 4                                   # mixing scratch
    live = 6 * rows_blk * C * 4                                  # xn/h/u/v/g (f32)
    vmem_limit = int(min(max(3 * (step_io + resident + scratch + live),
                             8 << 20), 64 << 20))

    out = pl.pallas_call(
        _make_kernel(approx_gelu),
        out_shape=jax.ShapeDtypeStruct((rows_total, C), x.dtype),
        grid_spec=pltpu.PrefetchScalarGridSpec(
            num_scalar_prefetch=0,
            grid=grid,
            in_specs=[
                pl.BlockSpec((rows_blk, C), lambda g: (g, 0)),            # x rows
                pl.BlockSpec((1, C), lambda g: (0, 0)),                   # LN weight
                pl.BlockSpec((1, C), lambda g: (0, 0)),                   # LN bias
                pl.BlockSpec((C, 2 * C), lambda g: (0, 0)),               # fc1 weight
                pl.BlockSpec((1, 2 * C), lambda g: (0, 0)),               # fc1 bias
                pl.BlockSpec((gamma, rows_blk, rows_blk),
                             lambda g: (0, 0, 0)),                        # posmap (bd)
                pl.BlockSpec((rows_blk, 1), lambda g: (0, 0)),            # token bias
                pl.BlockSpec((C, C), lambda g: (0, 0)),                   # fc2 weight
                pl.BlockSpec((1, C), lambda g: (0, 0)),                   # fc2 bias
            ],
            out_specs=pl.BlockSpec((rows_blk, C), lambda g: (g, 0)),
            scratch_shapes=[pltpu.VMEM((rows_blk, C), jnp.float32)],
        ),
        compiler_params=pltpu.CompilerParams(
            dimension_semantics=("parallel",),
            vmem_limit_bytes=vmem_limit),
        cost_estimate=cost,
    )(x_flat, ln_w, ln_b, w1p, b1p, posbd, token_bias, w2p, b2)

    return out[:G * N].reshape(B, Wn, N, C)


def reference(x, params, *, win_size, gamma):
    """Pure-JAX reference matching the PyTorch forward semantics."""
    B, Wn, N, C = x.shape
    ln_w, ln_b = params["ln_w"], params["ln_b"]
    w1, b1 = params["w1"], params["b1"]
    table = params["table"]
    token_bias = params["token_bias"]
    w2, b2 = params["w2"], params["b2"]

    mean = x.mean(-1, keepdims=True)
    var = ((x - mean) ** 2).mean(-1, keepdims=True)
    xn = (x - mean) / jnp.sqrt(var + 1e-5) * ln_w + ln_b
    h = xn @ w1 + b1
    h = 0.5 * h * (1.0 + lax.erf(h * _INV_SQRT2))
    u, v = h[..., :C], h[..., C:]

    rel = jnp.arange(N)[:, None] - jnp.arange(N)[None, :] + (N - 1)
    posmap = jnp.transpose(table[rel], (2, 0, 1))                 # (gamma, N, N)
    u5 = u.reshape(B, Wn, N, C // gamma, gamma)
    out5 = jnp.einsum('smn,bwnvs->bwmvs', posmap, u5)
    out5 = out5 + token_bias[None, None, :, None, None]
    u2 = out5.reshape(B, Wn, N, C)
    g = u2 * v
    return g @ w2 + b2


if __name__ == "__main__":
    B, Wn, N, C, GAMMA = 2, 2, 8, 32, 8   # win_size=8, dim=32, gamma=8
    key = jax.random.PRNGKey(0)
    ks = jax.random.split(key, 8)

    x = jax.random.normal(ks[0], (B, Wn, N, C), jnp.float32)

    # Deterministic synthetic parameters (shapes per PosMLPLayerT.__init__).
    # token_proj_n_bias / bias table are zeros at init in the original; small
    # random values are used so the positional path is actually exercised.
    params = dict(
        ln_w=jnp.ones((C,), jnp.float32),
        ln_b=jnp.zeros((C,), jnp.float32),
        w1=0.05 * jax.random.normal(ks[1], (C, 2 * C), jnp.float32),
        b1=0.05 * jax.random.normal(ks[2], (2 * C,), jnp.float32),
        table=0.05 * jax.random.normal(ks[3], (2 * N - 1, GAMMA), jnp.float32),
        token_bias=0.05 * jax.random.normal(ks[4], (N,), jnp.float32),
        w2=0.05 * jax.random.normal(ks[5], (C, C), jnp.float32),
        b2=0.05 * jax.random.normal(ks[6], (C,), jnp.float32),
    )

    ref = reference(x, params, win_size=N, gamma=GAMMA)

    # f32 MXU-input path: must match the PyTorch-equivalent reference tightly.
    out = posmlp_layer_t(x, params, win_size=N, gamma=GAMMA,
                         matmul_dtype=jnp.float32)
    out = jax.block_until_ready(out)
    err = float(jnp.max(jnp.abs(out - ref)))
    assert jnp.allclose(out, ref, atol=1e-5, rtol=1e-5), f"f32 max abs err {err}"

    # Default path (bf16 MXU inputs on all generations): looser tolerance.
    out_bf = posmlp_layer_t(x, params, win_size=N, gamma=GAMMA)
    out_bf = jax.block_until_ready(out_bf)
    err_bf = float(jnp.max(jnp.abs(out_bf - ref)))
    assert err_bf < 5e-2, f"bf16 max abs err {err_bf}"

    # tanh-approx GELU path (EUP transcendental), loose tolerance.
    out_tanh = posmlp_layer_t(x, params, win_size=N, gamma=GAMMA,
                              matmul_dtype=jnp.float32, approx_gelu=True)
    out_tanh = jax.block_until_ready(out_tanh)
    err_tanh = float(jnp.max(jnp.abs(out_tanh - ref)))
    assert err_tanh < 2e-2, f"tanh-gelu max abs err {err_tanh}"

    print("KERNEL_OK")
</pallas_src>

<mosaic_0001>
module attributes {stable_mosaic.version = 11 : i64} {
  func.func @posmlp_kernel(%arg0: i32, %arg1: memref<32x32xf32, #tpu.memory_space<vmem>>, %arg2: memref<1x32xf32, #tpu.memory_space<vmem>>, %arg3: memref<1x32xf32, #tpu.memory_space<vmem>>, %arg4: memref<32x64xf32, #tpu.memory_space<vmem>>, %arg5: memref<1x64xf32, #tpu.memory_space<vmem>>, %arg6: memref<8x32x32xf32, #tpu.memory_space<vmem>>, %arg7: memref<32x1xf32, #tpu.memory_space<vmem>>, %arg8: memref<32x32xf32, #tpu.memory_space<vmem>>, %arg9: memref<1x32xf32, #tpu.memory_space<vmem>>, %arg10: memref<32x32xf32, #tpu.memory_space<vmem>>, %arg11: memref<32x32xf32, #tpu.memory_space<vmem>>) attributes {dimension_semantics = [#tpu.dimension_semantics<parallel>], iteration_bounds = array<i64: 1>, scalar_prefetch = 0 : i64, scratch_operands = 1 : i64, tpu.core_type = #tpu.core_type<tc>, window_params = [{transform_indices = @transform_0, window_bounds = array<i64: 32, 32>}, {pipeline_mode = #tpu.pipeline_mode<synchronous>, transform_indices = @transform_1, window_bounds = array<i64: 1, 32>}, {pipeline_mode = #tpu.pipeline_mode<synchronous>, transform_indices = @transform_2, window_bounds = array<i64: 1, 32>}, {pipeline_mode = #tpu.pipeline_mode<synchronous>, transform_indices = @transform_3, window_bounds = array<i64: 32, 64>}, {pipeline_mode = #tpu.pipeline_mode<synchronous>, transform_indices = @transform_4, window_bounds = array<i64: 1, 64>}, {pipeline_mode = #tpu.pipeline_mode<synchronous>, transform_indices = @transform_5, window_bounds = array<i64: 8, 32, 32>}, {pipeline_mode = #tpu.pipeline_mode<synchronous>, transform_indices = @transform_6, window_bounds = array<i64: 32, 1>}, {pipeline_mode = #tpu.pipeline_mode<synchronous>, transform_indices = @transform_7, window_bounds = array<i64: 32, 32>}, {pipeline_mode = #tpu.pipeline_mode<synchronous>, transform_indices = @transform_8, window_bounds = array<i64: 1, 32>}, {transform_indices = @transform_9, window_bounds = array<i64: 32, 32>}]} {
    %c0 = arith.constant 0 : index
    %c0_0 = arith.constant 0 : index
    %0 = vector.load %arg1[%c0, %c0_0] : memref<32x32xf32, #tpu.memory_space<vmem>>, vector<32x32xf32>
    %cst = arith.constant dense<0.000000e+00> : vector<32xf32>
    %1 = vector.multi_reduction <add>, %0, %cst [1] : vector<32x32xf32> to vector<32xf32>
    %2 = vector.shape_cast %1 : vector<32xf32> to vector<32x1xf32>
    %cst_1 = arith.constant 3.200000e+01 : f32
    %3 = vector.broadcast %cst_1 : f32 to vector<32x1xf32>
    %4 = arith.divf %2, %3 : vector<32x1xf32>
    %5 = arith.mulf %0, %0 : vector<32x32xf32>
    %cst_2 = arith.constant dense<0.000000e+00> : vector<32xf32>
    %6 = vector.multi_reduction <add>, %5, %cst_2 [1] : vector<32x32xf32> to vector<32xf32>
    %7 = vector.shape_cast %6 : vector<32xf32> to vector<32x1xf32>
    %cst_3 = arith.constant 3.200000e+01 : f32
    %8 = vector.broadcast %cst_3 : f32 to vector<32x1xf32>
    %9 = arith.divf %7, %8 : vector<32x1xf32>
    %10 = arith.mulf %4, %4 : vector<32x1xf32>
    %11 = arith.subf %9, %10 : vector<32x1xf32>
    %12 = vector.broadcast %4 : vector<32x1xf32> to vector<32x32xf32>
    %13 = arith.subf %0, %12 : vector<32x32xf32>
    %cst_4 = arith.constant 9.99999974E-6 : f32
    %14 = vector.broadcast %cst_4 : f32 to vector<32x1xf32>
    %15 = arith.addf %11, %14 : vector<32x1xf32>
    %16 = math.rsqrt %15 : vector<32x1xf32>
    %17 = vector.broadcast %16 : vector<32x1xf32> to vector<32x32xf32>
    %18 = arith.mulf %13, %17 : vector<32x32xf32>
    %c0_5 = arith.constant 0 : index
    %c0_6 = arith.constant 0 : index
    %19 = vector.load %arg2[%c0_5, %c0_6] : memref<1x32xf32, #tpu.memory_space<vmem>>, vector<1x32xf32>
    %20 = vector.broadcast %19 : vector<1x32xf32> to vector<32x32xf32>
    %21 = arith.mulf %18, %20 : vector<32x32xf32>
    %c0_7 = arith.constant 0 : index
    %c0_8 = arith.constant 0 : index
    %22 = vector.load %arg3[%c0_7, %c0_8] : memref<1x32xf32, #tpu.memory_space<vmem>>, vector<1x32xf32>
    %23 = vector.broadcast %22 : vector<1x32xf32> to vector<32x32xf32>
    %24 = arith.addf %21, %23 : vector<32x32xf32>
    %c0_9 = arith.constant 0 : index
    %c0_10 = arith.constant 0 : index
    %25 = vector.load %arg4[%c0_9, %c0_10] : memref<32x64xf32, #tpu.memory_space<vmem>>, vector<32x64xf32>
    %cst_11 = arith.constant dense<0.000000e+00> : vector<32x64xf32>
    %26 = tpu.matmul %24, %25, %cst_11 {dimension_numbers = #tpu.dot_dimension_numbers<[1], [0], [0], [1], [0, 0, 1, 1], [], []>} : vector<32x32xf32>, vector<32x64xf32>, vector<32x64xf32> -> vector<32x64xf32>
    %c0_12 = arith.constant 0 : index
    %c0_13 = arith.constant 0 : index
    %27 = vector.load %arg5[%c0_12, %c0_13] : memref<1x64xf32, #tpu.memory_space<vmem>>, vector<1x64xf32>
    %28 = vector.broadcast %27 : vector<1x64xf32> to vector<32x64xf32>
    %29 = arith.addf %26, %28 : vector<32x64xf32>
    %cst_14 = arith.constant 5.000000e-01 : f32
    %30 = vector.broadcast %cst_14 : f32 to vector<32x64xf32>
    %31 = arith.mulf %30, %29 : vector<32x64xf32>
    %cst_15 = arith.constant 0.707106769 : f32
    %32 = vector.broadcast %cst_15 : f32 to vector<32x64xf32>
    %33 = arith.mulf %29, %32 : vector<32x64xf32>
    %34 = math.erf %33 : vector<32x64xf32>
    %cst_16 = arith.constant 1.000000e+00 : f32
    %35 = vector.broadcast %cst_16 : f32 to vector<32x64xf32>
    %36 = arith.addf %35, %34 : vector<32x64xf32>
    %37 = arith.mulf %31, %36 : vector<32x64xf32>
    %38 = vector.extract_strided_slice %37 {offsets = [0, 0], sizes = [32, 32], strides = [1, 1]} : vector<32x64xf32> to vector<32x32xf32>
    %39 = vector.extract_strided_slice %37 {offsets = [0, 32], sizes = [32, 32], strides = [1, 1]} : vector<32x64xf32> to vector<32x32xf32>
    %c0_17 = arith.constant 0 : index
    %c0_18 = arith.constant 0 : index
    %c0_19 = arith.constant 0 : index
    %40 = vector.load %arg6[%c0_17, %c0_18, %c0_19] : memref<8x32x32xf32, #tpu.memory_space<vmem>>, vector<1x32x32xf32>
    %41 = vector.shape_cast %40 : vector<1x32x32xf32> to vector<32x32xf32>
    %42 = vector.extract_strided_slice %38 {offsets = [0, 0], sizes = [32, 4], strides = [1, 1]} : vector<32x32xf32> to vector<32x4xf32>
    %cst_20 = arith.constant dense<0.000000e+00> : vector<32x4xf32>
    %43 = tpu.matmul %41, %42, %cst_20 {dimension_numbers = #tpu.dot_dimension_numbers<[1], [0], [0], [1], [0, 0, 1, 1], [], []>} : vector<32x32xf32>, vector<32x4xf32>, vector<32x4xf32> -> vector<32x4xf32>
    %c0_21 = arith.constant 0 : index
    %c0_22 = arith.constant 0 : index
    %44 = vector.load %arg11[%c0_21, %c0_22] : memref<32x32xf32, #tpu.memory_space<vmem>>, vector<32x4xf32>
    tpu.vector_store %arg11[%c0_21, %c0_22], %43 {strides = array<i32>} : memref<32x32xf32, #tpu.memory_space<vmem>>, vector<32x4xf32>,
    %c1 = arith.constant 1 : index
    %c0_23 = arith.constant 0 : index
    %c0_24 = arith.constant 0 : index
    %45 = vector.load %arg6[%c1, %c0_23, %c0_24] : memref<8x32x32xf32, #tpu.memory_space<vmem>>, vector<1x32x32xf32>
    %46 = vector.shape_cast %45 : vector<1x32x32xf32> to vector<32x32xf32>
    %47 = vector.extract_strided_slice %38 {offsets = [0, 4], sizes = [32, 4], strides = [1, 1]} : vector<32x32xf32> to vector<32x4xf32>
    %cst_25 = arith.constant dense<0.000000e+00> : vector<32x4xf32>
    %48 = tpu.matmul %46, %47, %cst_25 {dimension_numbers = #tpu.dot_dimension_numbers<[1], [0], [0], [1], [0, 0, 1, 1], [], []>} : vector<32x32xf32>, vector<32x4xf32>, vector<32x4xf32> -> vector<32x4xf32>
    %c0_26 = arith.constant 0 : index
    %c4 = arith.constant 4 : index
    %49 = vector.load %arg11[%c0_26, %c4] : memref<32x32xf32, #tpu.memory_space<vmem>>, vector<32x4xf32>
    tpu.vector_store %arg11[%c0_26, %c4], %48 {strides = array<i32>} : memref<32x32xf32, #tpu.memory_space<vmem>>, vector<32x4xf32>,
    %c2 = arith.constant 2 : index
    %c0_27 = arith.constant 0 : index
    %c0_28 = arith.constant 0 : index
    %50 = vector.load %arg6[%c2, %c0_27, %c0_28] : memref<8x32x32xf32, #tpu.memory_space<vmem>>, vector<1x32x32xf32>
    %51 = vector.shape_cast %50 : vector<1x32x32xf32> to vector<32x32xf32>
    %52 = vector.extract_strided_slice %38 {offsets = [0, 8], sizes = [32, 4], strides = [1, 1]} : vector<32x32xf32> to vector<32x4xf32>
    %cst_29 = arith.constant dense<0.000000e+00> : vector<32x4xf32>
    %53 = tpu.matmul %51, %52, %cst_29 {dimension_numbers = #tpu.dot_dimension_numbers<[1], [0], [0], [1], [0, 0, 1, 1], [], []>} : vector<32x32xf32>, vector<32x4xf32>, vector<32x4xf32> -> vector<32x4xf32>
    %c0_30 = arith.constant 0 : index
    %c8 = arith.constant 8 : index
    %54 = vector.load %arg11[%c0_30, %c8] : memref<32x32xf32, #tpu.memory_space<vmem>>, vector<32x4xf32>
    tpu.vector_store %arg11[%c0_30, %c8], %53 {strides = array<i32>} : memref<32x32xf32, #tpu.memory_space<vmem>>, vector<32x4xf32>,
    %c3 = arith.constant 3 : index
    %c0_31 = arith.constant 0 : index
    %c0_32 = arith.constant 0 : index
    %55 = vector.load %arg6[%c3, %c0_31, %c0_32] : memref<8x32x32xf32, #tpu.memory_space<vmem>>, vector<1x32x32xf32>
    %56 = vector.shape_cast %55 : vector<1x32x32xf32> to vector<32x32xf32>
    %57 = vector.extract_strided_slice %38 {offsets = [0, 12], sizes = [32, 4], strides = [1, 1]} : vector<32x32xf32> to vector<32x4xf32>
    %cst_33 = arith.constant dense<0.000000e+00> : vector<32x4xf32>
    %58 = tpu.matmul %56, %57, %cst_33 {dimension_numbers = #tpu.dot_dimension_numbers<[1], [0], [0], [1], [0, 0, 1, 1], [], []>} : vector<32x32xf32>, vector<32x4xf32>, vector<32x4xf32> -> vector<32x4xf32>
    %c0_34 = arith.constant 0 : index
    %c12 = arith.constant 12 : index
    %59 = vector.load %arg11[%c0_34, %c12] : memref<32x32xf32, #tpu.memory_space<vmem>>, vector<32x4xf32>
    tpu.vector_store %arg11[%c0_34, %c12], %58 {strides = array<i32>} : memref<32x32xf32, #tpu.memory_space<vmem>>, vector<32x4xf32>,
    %c4_35 = arith.constant 4 : index
    %c0_36 = arith.constant 0 : index
    %c0_37 = arith.constant 0 : index
    %60 = vector.load %arg6[%c4_35, %c0_36, %c0_37] : memref<8x32x32xf32, #tpu.memory_space<vmem>>, vector<1x32x32xf32>
    %61 = vector.shape_cast %60 : vector<1x32x32xf32> to vector<32x32xf32>
    %62 = vector.extract_strided_slice %38 {offsets = [0, 16], sizes = [32, 4], strides = [1, 1]} : vector<32x32xf32> to vector<32x4xf32>
    %cst_38 = arith.constant dense<0.000000e+00> : vector<32x4xf32>
    %63 = tpu.matmul %61, %62, %cst_38 {dimension_numbers = #tpu.dot_dimension_numbers<[1], [0], [0], [1], [0, 0, 1, 1], [], []>} : vector<32x32xf32>, vector<32x4xf32>, vector<32x4xf32> -> vector<32x4xf32>
    %c0_39 = arith.constant 0 : index
    %c16 = arith.constant 16 : index
    %64 = vector.load %arg11[%c0_39, %c16] : memref<32x32xf32, #tpu.memory_space<vmem>>, vector<32x4xf32>
    tpu.vector_store %arg11[%c0_39, %c16], %63 {strides = array<i32>} : memref<32x32xf32, #tpu.memory_space<vmem>>, vector<32x4xf32>,
    %c5 = arith.constant 5 : index
    %c0_40 = arith.constant 0 : index
    %c0_41 = arith.constant 0 : index
    %65 = vector.load %arg6[%c5, %c0_40, %c0_41] : memref<8x32x32xf32, #tpu.memory_space<vmem>>, vector<1x32x32xf32>
    %66 = vector.shape_cast %65 : vector<1x32x32xf32> to vector<32x32xf32>
    %67 = vector.extract_strided_slice %38 {offsets = [0, 20], sizes = [32, 4], strides = [1, 1]} : vector<32x32xf32> to vector<32x4xf32>
    %cst_42 = arith.constant dense<0.000000e+00> : vector<32x4xf32>
    %68 = tpu.matmul %66, %67, %cst_42 {dimension_numbers = #tpu.dot_dimension_numbers<[1], [0], [0], [1], [0, 0, 1, 1], [], []>} : vector<32x32xf32>, vector<32x4xf32>, vector<32x4xf32> -> vector<32x4xf32>
    %c0_43 = arith.constant 0 : index
    %c20 = arith.constant 20 : index
    %69 = vector.load %arg11[%c0_43, %c20] : memref<32x32xf32, #tpu.memory_space<vmem>>, vector<32x4xf32>
    tpu.vector_store %arg11[%c0_43, %c20], %68 {strides = array<i32>} : memref<32x32xf32, #tpu.memory_space<vmem>>, vector<32x4xf32>,
    %c6 = arith.constant 6 : index
    %c0_44 = arith.constant 0 : index
    %c0_45 = arith.constant 0 : index
    %70 = vector.load %arg6[%c6, %c0_44, %c0_45] : memref<8x32x32xf32, #tpu.memory_space<vmem>>, vector<1x32x32xf32>
    %71 = vector.shape_cast %70 : vector<1x32x32xf32> to vector<32x32xf32>
    %72 = vector.extract_strided_slice %38 {offsets = [0, 24], sizes = [32, 4], strides = [1, 1]} : vector<32x32xf32> to vector<32x4xf32>
    %cst_46 = arith.constant dense<0.000000e+00> : vector<32x4xf32>
    %73 = tpu.matmul %71, %72, %cst_46 {dimension_numbers = #tpu.dot_dimension_numbers<[1], [0], [0], [1], [0, 0, 1, 1], [], []>} : vector<32x32xf32>, vector<32x4xf32>, vector<32x4xf32> -> vector<32x4xf32>
    %c0_47 = arith.constant 0 : index
    %c24 = arith.constant 24 : index
    %74 = vector.load %arg11[%c0_47, %c24] : memref<32x32xf32, #tpu.memory_space<vmem>>, vector<32x4xf32>
    tpu.vector_store %arg11[%c0_47, %c24], %73 {strides = array<i32>} : memref<32x32xf32, #tpu.memory_space<vmem>>, vector<32x4xf32>,
    %c7 = arith.constant 7 : index
    %c0_48 = arith.constant 0 : index
    %c0_49 = arith.constant 0 : index
    %75 = vector.load %arg6[%c7, %c0_48, %c0_49] : memref<8x32x32xf32, #tpu.memory_space<vmem>>, vector<1x32x32xf32>
    %76 = vector.shape_cast %75 : vector<1x32x32xf32> to vector<32x32xf32>
    %77 = vector.extract_strided_slice %38 {offsets = [0, 28], sizes = [32, 4], strides = [1, 1]} : vector<32x32xf32> to vector<32x4xf32>
    %cst_50 = arith.constant dense<0.000000e+00> : vector<32x4xf32>
    %78 = tpu.matmul %76, %77, %cst_50 {dimension_numbers = #tpu.dot_dimension_numbers<[1], [0], [0], [1], [0, 0, 1, 1], [], []>} : vector<32x32xf32>, vector<32x4xf32>, vector<32x4xf32> -> vector<32x4xf32>
    %c0_51 = arith.constant 0 : index
    %c28 = arith.constant 28 : index
    %79 = vector.load %arg11[%c0_51, %c28] : memref<32x32xf32, #tpu.memory_space<vmem>>, vector<32x4xf32>
    tpu.vector_store %arg11[%c0_51, %c28], %78 {strides = array<i32>} : memref<32x32xf32, #tpu.memory_space<vmem>>, vector<32x4xf32>,
    %c0_52 = arith.constant 0 : index
    %c0_53 = arith.constant 0 : index
    %80 = vector.load %arg11[%c0_52, %c0_53] : memref<32x32xf32, #tpu.memory_space<vmem>>, vector<32x32xf32>
    %c0_54 = arith.constant 0 : index
    %c0_55 = arith.constant 0 : index
    %81 = vector.load %arg7[%c0_54, %c0_55] : memref<32x1xf32, #tpu.memory_space<vmem>>, vector<32x1xf32>
    %82 = vector.broadcast %81 : vector<32x1xf32> to vector<32x32xf32>
    %83 = arith.addf %80, %82 : vector<32x32xf32>
    %84 = arith.mulf %83, %39 : vector<32x32xf32>
    %c0_56 = arith.constant 0 : index
    %c0_57 = arith.constant 0 : index
    %85 = vector.load %arg8[%c0_56, %c0_57] : memref<32x32xf32, #tpu.memory_space<vmem>>, vector<32x32xf32>
    %cst_58 = arith.constant dense<0.000000e+00> : vector<32x32xf32>
    %86 = tpu.matmul %84, %85, %cst_58 {dimension_numbers = #tpu.dot_dimension_numbers<[1], [0], [0], [1], [0, 0, 1, 1], [], []>} : vector<32x32xf32>, vector<32x32xf32>, vector<32x32xf32> -> vector<32x32xf32>
    %c0_59 = arith.constant 0 : index
    %c0_60 = arith.constant 0 : index
    %87 = vector.load %arg9[%c0_59, %c0_60] : memref<1x32xf32, #tpu.memory_space<vmem>>, vector<1x32xf32>
    %88 = vector.broadcast %87 : vector<1x32xf32> to vector<32x32xf32>
    %89 = arith.addf %86, %88 : vector<32x32xf32>
    %c0_61 = arith.constant 0 : index
    %c0_62 = arith.constant 0 : index
    %90 = vector.load %arg10[%c0_61, %c0_62] : memref<32x32xf32, #tpu.memory_space<vmem>>, vector<32x32xf32>
    tpu.vector_store %arg10[%c0_61, %c0_62], %89 {strides = array<i32>} : memref<32x32xf32, #tpu.memory_space<vmem>>, vector<32x32xf32>,
    return
  }
  func.func @transform_0(%arg0: i32) -> (i32, i32) {
    %c0_i32 = arith.constant 0 : i32
    %c0_i32_0 = arith.constant 0 : i32
    return %arg0, %c0_i32 : i32, i32
  }
  func.func @transform_1(%arg0: i32) -> (i32, i32) {
    %c0_i32 = arith.constant 0 : i32
    %c0_i32_0 = arith.constant 0 : i32
    %c0_i32_1 = arith.constant 0 : i32
    return %c0_i32, %c0_i32_0 : i32, i32
  }
  func.func @transform_2(%arg0: i32) -> (i32, i32) {
    %c0_i32 = arith.constant 0 : i32
    %c0_i32_0 = arith.constant 0 : i32
    %c0_i32_1 = arith.constant 0 : i32
    return %c0_i32, %c0_i32_0 : i32, i32
  }
  func.func @transform_3(%arg0: i32) -> (i32, i32) {
    %c0_i32 = arith.constant 0 : i32
    %c0_i32_0 = arith.constant 0 : i32
    %c0_i32_1 = arith.constant 0 : i32
    return %c0_i32, %c0_i32_0 : i32, i32
  }
  func.func @transform_4(%arg0: i32) -> (i32, i32) {
    %c0_i32 = arith.constant 0 : i32
    %c0_i32_0 = arith.constant 0 : i32
    %c0_i32_1 = arith.constant 0 : i32
    return %c0_i32, %c0_i32_0 : i32, i32
  }
  func.func @transform_5(%arg0: i32) -> (i32, i32, i32) {
    %c0_i32 = arith.constant 0 : i32
    %c0_i32_0 = arith.constant 0 : i32
    %c0_i32_1 = arith.constant 0 : i32
    %c0_i32_2 = arith.constant 0 : i32
    return %c0_i32, %c0_i32_0, %c0_i32_1 : i32, i32, i32
  }
  func.func @transform_6(%arg0: i32) -> (i32, i32) {
    %c0_i32 = arith.constant 0 : i32
    %c0_i32_0 = arith.constant 0 : i32
    %c0_i32_1 = arith.constant 0 : i32
    return %c0_i32, %c0_i32_0 : i32, i32
  }
  func.func @transform_7(%arg0: i32) -> (i32, i32) {
    %c0_i32 = arith.constant 0 : i32
    %c0_i32_0 = arith.constant 0 : i32
    %c0_i32_1 = arith.constant 0 : i32
    return %c0_i32, %c0_i32_0 : i32, i32
  }
  func.func @transform_8(%arg0: i32) -> (i32, i32) {
    %c0_i32 = arith.constant 0 : i32
    %c0_i32_0 = arith.constant 0 : i32
    %c0_i32_1 = arith.constant 0 : i32
    return %c0_i32, %c0_i32_0 : i32, i32
  }
  func.func @transform_9(%arg0: i32) -> (i32, i32) {
    %c0_i32 = arith.constant 0 : i32
    %c0_i32_0 = arith.constant 0 : i32
    return %arg0, %c0_i32 : i32, i32
  }
}

</mosaic_0001>

<bundles_post_ra>
// kernel: tpu_custom_call.1
= control target key start
LH: loop header
LB: loop body
LE: loop exit
PB: predicated region body
PF: predicated region fallthrough
CT: control target
= control target key end

     0   :  { %14 = vsyncpa [#allocation4], 0  ;;  %s2362_s0 = inlined_call_operand.vmem [shape: f32[32,32], index: 0, kind: input, shape index: {}]   ;;  %s2363_s1 = inlined_call_operand.vmem [shape: f32[1,32], index: 1, kind: input, shape index: {}]   ;;  %s2364_s2 = inlined_call_operand.vmem [shape: f32[1,32], index: 2, kind: input, shape index: {}]   ;;  %s2365_s3 = inlined_call_operand.hbm [shape: f32[32,64], index: 3, kind: input, shape index: {}]   ;;  %s2366_s4 = inlined_call_operand.vmem [shape: f32[1,64], index: 4, kind: input, shape index: {}]   ;;  %s2367_s5 = inlined_call_operand.hbm [shape: f32[8,32,32], index: 5, kind: input, shape index: {}]   ;;  %s2368_s6 = inlined_call_operand.vmem [shape: f32[32,1], index: 6, kind: input, shape index: {}]   ;;  %s2369_s7 = inlined_call_operand.hbm [shape: f32[32,32], index: 7, kind: input, shape index: {}]   ;;  %s2370_s8 = inlined_call_operand.vmem [shape: f32[1,32], index: 8, kind: input, shape index: {}]   ;;  %s2371_s9 = inlined_call_operand.hbm [shape: f32[32,32], index: 9, kind: output, shape index: {}]  }
   0x1   :  { %15 = vsyncpa [#allocation7], 0 }
   0x2   :  { %16 = vsyncpa [#allocation5], 0  ;;  %s2070_s30 = smov [#allocation6]   ;;  %s2071_s11 = smov [#allocation3]  }
   0x3   :  { %s42_s10 = sshll.u32 %s2070_s30, 4  ;;  %s28_s12 = sshll.u32 %s2071_s11, 4  ;;  %s43_s10 = int_to_ptr.vmem [resolvable:$true] %s42_s10  ;;  %s2141_s12 = int_to_ptr.vmem [resolvable:$true] %s28_s12 }
   0x4   :  { %s1976_s15 = scalar_lea.hbm %s2367_s5, 4096 }
   0x5   :  { %p1977_p0 = scmp.ne.s32.totalorder %s2367_s5, %s1976_s15  ;;  %p1980_p1 = scmp.lt.u32.totalorder %s1976_s15, %s2367_s5 }
   0x7   :  { %p1982_p2 = pnand %p1980_p1, %p1977_p0 }
   0x9   :  { %1985 = shalt.err (!%p1982_p2)
}
   0xa   :  { %s1986_s20 = scalar_lea.vmem %s43_s10, 4096  ;;  %p1991_p4 = scmp.lt.s32.totalorder %s43_s10, %s43_s10 }
   0xb   :  { %p1987_p3 = scmp.ne.s32.totalorder %s43_s10, %s1986_s20  ;;  %p1992_p5 = scmp.lt.s32.totalorder %s1986_s20, %s1986_s20 }
   0xd   :  { %p1993_p6 = por %p1992_p5, %p1991_p4 }
   0xf   :  { %p1994_p7 = pnand %p1993_p6, %p1987_p3 }
  0x11   :  { %1997 = shalt.err (!%p1994_p7)
}
  0x12   :  { %s2072_s21 = smov 128   ;;  %s2073_s22 = smov 8  }
  0x13   :  { %48 = dma.hbm_to_vmem [thread:$0]  %s2367_s5, 4096, %s43_s10, [#allocation7], %s2072_s21, %s2072_s21, %s2073_s22  }
  0x14   :  { %s1998_s27 = scalar_lea.hbm %s2365_s3, 512 }
  0x15   :  { %p1999_p8 = scmp.ne.s32.totalorder %s2365_s3, %s1998_s27  ;;  %p2002_p9 = scmp.lt.u32.totalorder %s1998_s27, %s2365_s3 }
  0x17   :  { %p2004_p10 = pnand %p2002_p9, %p1999_p8 }
  0x19   :  { %2007 = shalt.err (!%p2004_p10)
}
  0x1a   :  { %s2008_s13 = scalar_lea.vmem %s2141_s12, 512  ;;  %p2013_p12 = scmp.lt.s32.totalorder %s2141_s12, %s2141_s12 }
  0x1b   :  { %p2009_p11 = scmp.ne.s32.totalorder %s2141_s12, %s2008_s13  ;;  %p2014_p13 = scmp.lt.s32.totalorder %s2008_s13, %s2008_s13 }
  0x1d   :  { %p2015_p0 = por %p2014_p13, %p2013_p12 }
  0x1f   :  { %p2016_p1 = pnand %p2015_p0, %p2009_p11 }
  0x21   :  { %2019 = shalt.err (!%p2016_p1)
}
  0x22   :  { %34 = dma.hbm_to_vmem [thread:$0]  %s2365_s3, 512, %s2141_s12, [#allocation4], %s2072_s21, %s2072_s21, %s2073_s22  }
  0x23   :  { %s2074_s14 = smov [#allocation8]   ;;  %s2020_s18 = scalar_lea.hbm %s2369_s7, 512 }
  0x24   :  { %s56_s15 = sshll.u32 %s2074_s14, 4  ;;  %p2021_p2 = scmp.ne.s32.totalorder %s2369_s7, %s2020_s18  ;;  %s57_s15 = int_to_ptr.vmem [resolvable:$true] %s56_s15 }
  0x25   :  { %p2024_p3 = scmp.lt.u32.totalorder %s2020_s18, %s2369_s7 }
  0x27   :  { %p2026_p4 = pnand %p2024_p3, %p2021_p2 }
  0x29   :  { %2029 = shalt.err (!%p2026_p4)
}
  0x2a   :  { %s2030_s25 = scalar_lea.vmem %s57_s15, 512  ;;  %p2035_p6 = scmp.lt.s32.totalorder %s57_s15, %s57_s15 }
  0x2b   :  { %p2031_p5 = scmp.ne.s32.totalorder %s57_s15, %s2030_s25  ;;  %p2036_p7 = scmp.lt.s32.totalorder %s2030_s25, %s2030_s25 }
  0x2d   :  { %p2037_p8 = por %p2036_p7, %p2035_p6 }
  0x2f   :  { %p2038_p9 = pnand %p2037_p8, %p2031_p5 }
  0x31   :  { %2041 = shalt.err (!%p2038_p9)
}
  0x32   :  { %62 = dma.hbm_to_vmem [thread:$0]  %s2369_s7, 512, %s57_s15, [#allocation7], %s2072_s21, %s2072_s21, %s2073_s22  }
  0x33   :  { %2064 = dma.done.wait [#allocation4], 512  }
  0x34   :  { %2065 = vsyncadd [#allocation4], 4294966784 }
  0x35   :  { %2066 = dma.done.wait [#allocation7], 4608  }
  0x36   :  { %2067 = vsyncadd [#allocation7], 4294962688  ;;  %vm78_vm0 = vcmask 261120   ;;  %v2196_v0 = vld [vmem:[%s2362_s0 + $0x18] sm:$0xff]  ;;  %v2201_v1 = vld [vmem:[%s2362_s0] sm:$0xff]  ;;  %s2076_s15 = smov 124  }
  0x37   :  { %v2206_v2 = vld [vmem:[%s2362_s0 + $0x8] sm:$0xff]  ;;  %v88_v3 = vsel %vm78_vm0, %v2196_v0, 0.0  ;;  %v79_v4 = vsel %vm78_vm0, %v2201_v1, 0.0  ;;  %v96_v5 = vmul.f32 %v2201_v1, %v2201_v1  ;;  %v2222_v9 = vld [vmem:[%s2362_s0 + $0x10] sm:$0xff]  ;;  %v99_v12 = vmul.f32 %v2196_v0, %v2196_v0  ;;  %v162_v16 = vld [vmem:[#allocation3] sm:$0xff]  ;;  %s2077_s16 = smov 112  }
  0x38   :  { %89 = vadd.xlane.f32.xlu1 %v88_v3  ;;  %80 = vadd.xlane.f32.xlu0 %v79_v4  ;;  %v82_v7 = vsel %vm78_vm0, %v2206_v2, 0.0  ;;  %v97_v8 = vmul.f32 %v2206_v2, %v2206_v2  ;;  %v85_v11 = vsel %vm78_vm0, %v2222_v9, 0.0  ;;  %v98_v13 = vmul.f32 %v2222_v9, %v2222_v9  ;;  %v163_v17 = vld [vmem:[#allocation3 + $0x8] sm:$0xff]  ;;  %v164_v18 = vld [vmem:[#allocation3 + $0x10] sm:$0xff]  ;;  %v165_v20 = vld [vmem:[#allocation3 + $0x18] sm:$0xff]  ;;  %s2078_s17 = smov 116  }
  0x39   :  { %v100_v6 = vsel %vm78_vm0, %v96_v5, 0.0  ;;  %v109_v14 = vsel %vm78_vm0, %v99_v12, 0.0  ;;  %v1787_v19 = vpack.c.bf16 %v163_v17, %v162_v16  ;;  %v1791_v21 = vpack.c.bf16 %v165_v20, %v164_v18  ;;  %v1523_v52 = vld [vmem:[%s2363_s1] ss:$0 sm:$0xff]  ;;  %s2079_s18 = smov 104   ;;  %s2080_s19 = smov 108  }
  0x3a   :  { %v103_v10 = vsel %vm78_vm0, %v97_v8, 0.0  ;;  %v106_v15 = vsel %vm78_vm0, %v98_v13, 0.0  ;;  %v1524_v54 = vld [vmem:[%s2364_s2] ss:$0 sm:$0xff]  ;;  %s2081_s20 = smov 100   ;;  %vm391_vm1 = vcmask 31744  }
  0x3b   :  { %1788 = vmatprep.subr.bf16.mxu0 %v1787_v19  ;;  %s2083_s12 = smov 4   ;;  %s2084_s26 = smov 12   ;;  %vm530_vm2 = vcmask 64544   ;;  %vm665_vm3 = vcmask 97344   ;;  %vm800_vm4 = vcmask 130144   ;;  %vm935_vm5 = vcmask 162944  }
  0x3c   :  { %101 = vadd.xlane.f32.xlu1 %v100_v6  ;;  %83 = vadd.xlane.f32.xlu0 %v82_v7  ;;  %s2085_s27 = smov 16   ;;  %s2086_s28 = smov 20   ;;  %vm1070_vm6 = vcmask 195744   ;;  %vm1205_vm7 = vcmask 228544   ;;  %vm1340_vm8 = vcmask 261344  }
  0x3d   :  { %1790 = vmatpush3.bf16.msra.mxu0 %v1787_v19  ;;  %s2087_s29 = smov 24   ;;  %s2088_s30 = smov 28  }
  0x3e   :  { %1792 = vmatprep.subr.bf16.mxu0 %v1791_v21  ;;  %s2089_s5 = smov 96   ;;  %s2090_s14 = smov [#allocation9]  }
  0x3f   :  { %s1510_s1 = sshll.u32 %s2090_s14, 4  ;;  %s1511_s1 = int_to_ptr.vmem [resolvable:$true] %s1510_s1 }
  0x40   :  { %104 = vadd.xlane.f32.xlu1 %v103_v10  ;;  %86 = vadd.xlane.f32.xlu0 %v85_v11  ;;  %p2047_p11 = scmp.lt.s32.totalorder %s1511_s1, %s1511_s1 }
  0x41   :  { %1794 = vmatpush3.bf16.msra.mxu0 %v1791_v21  ;;  %v290_v21 = vld [vmem:[#allocation6] sm:$0xff] }
  0x42   :  { %1669 = vmatprep.mubr.msk.f32.mxu1 %vm78_vm0, %v290_v21 }
  0x44   :  { %110 = vadd.xlane.f32.xlu1 %v109_v14  ;;  %107 = vadd.xlane.f32.xlu0 %v106_v15 }
  0xc5   :  { %v90_v22 = vpop.xlane.xlu1 %89  ;;  %v81_v23 = vpop.xlane.xlu0 %80 }
  0xc6   :  { %v92_v24 = vmul.f32 0.03125, %v81_v23  ;;  %v95_v31 = vmul.f32 0.03125, %v90_v22 }
  0xc8   :  { %v116_v27 = vmul.f32 %v92_v24, %v92_v24  ;;  %v119_v39 = vmul.f32 %v95_v31, %v95_v31  ;;  %v124_v50 = vsub.f32 %v2201_v1, %v92_v24  ;;  %v127_v60 = vsub.f32 %v2196_v0, %v95_v31  ;;  %v1525_v0 = vld [vmem:[%s2366_s4] ss:$0 sm:$0xff]  ;;  %s2075_s4 = smov 120  }
  0xc9   :  { %v102_v25 = vpop.xlane.xlu1 %101  ;;  %v84_v26 = vpop.xlane.xlu0 %83 }
  0xca   :  { %v112_v28 = vmul.f32 0.03125, %v102_v25  ;;  %v93_v29 = vmul.f32 0.03125, %v84_v26 }
  0xcc   :  { %v120_v30 = vsub.f32 %v112_v28, %v116_v27  ;;  %v117_v35 = vmul.f32 %v93_v29, %v93_v29  ;;  %v125_v55 = vsub.f32 %v2206_v2, %v93_v29 }
  0xcd   :  { %v105_v32 = vpop.xlane.xlu1 %104  ;;  %v87_v33 = vpop.xlane.xlu0 %86 }
  0xce   :  { %v128_v34 = vadd.f32 1e-05, %v120_v30  ;;  %v113_v36 = vmul.f32 0.03125, %v105_v32  ;;  %v94_v37 = vmul.f32 0.03125, %v87_v33 }
  0xd0   :  { %1960 = vrsqrt.f32 %v128_v34  ;;  %v121_v38 = vsub.f32 %v113_v36, %v117_v35  ;;  %v118_v43 = vmul.f32 %v94_v37, %v94_v37  ;;  %v126_v63 = vsub.f32 %v2222_v9, %v94_v37  ;;  %v397_v36 = vld [vmem:[#allocation6 + $0x20] sm:$0xff] }
  0xd1   :  { %v111_v40 = vpop.xlane.xlu1 %110  ;;  %v108_v41 = vpop.xlane.xlu0 %107 }
  0xd2   :  { %v129_v42 = vadd.f32 1e-05, %v121_v38  ;;  %v115_v44 = vmul.f32 0.03125, %v111_v40  ;;  %v114_v45 = vmul.f32 0.03125, %v108_v41 }
  0xd4   :  { %1962 = vrsqrt.f32 %v129_v42  ;;  %v123_v46 = vsub.f32 %v115_v44, %v119_v39  ;;  %v122_v47 = vsub.f32 %v114_v45, %v118_v43  ;;  %v291_v43 = vld [vmem:[#allocation6 + $0x8] sm:$0xff]  ;;  %v292_v44 = vld [vmem:[#allocation6 + $0x10] sm:$0xff]  ;;  %v293_v45 = vld [vmem:[#allocation6 + $0x18] sm:$0xff] }
  0xd6   :  { %v131_v48 = vadd.f32 1e-05, %v123_v46  ;;  %v130_v49 = vadd.f32 1e-05, %v122_v47  ;;  %v536_v46 = vld [vmem:[#allocation6 + $0x40] sm:$0xff]  ;;  %v1350_v47 = vld [vmem:[%s2368_s6 + $0x8] sm:$0xff] }
  0xd8   :  { %1964 = vrsqrt.f32 %v131_v48  ;;  %v2082_v48 = vmov 0  }
  0xd9   :  { %1966 = vrsqrt.f32 %v130_v49  ;;  %1958 = vset.pattern.permute.xlu1 %v2082_v48  ;;  %1959 = vset.pattern.permute.xlu0 %v2082_v48  ;;  %v1349_v49 = vld [vmem:[%s2368_s6] sm:$0xff] }
  0xda   :  { %v1961_v51 = vpop.eup %1960 }
  0xdb   :  { %v136_v53 = vmul.f32 %v1961_v51, %v124_v50 }
  0xdd   :  { %v147_v56 = vmul.f32 %v1523_v52, %v136_v53 }
  0xde   :  { %v1963_v57 = vpop.eup %1962 }
  0xdf   :  { %v158_v58 = vadd.f32 %v1524_v54, %v147_v56  ;;  %v137_v59 = vmul.f32 %v1963_v57, %v125_v55 }
  0xe1   :  { %1655 = vmatprep.mubr.msk.f32.mxu0 %vm78_vm0, %v158_v58  ;;  %v148_v61 = vmul.f32 %v1523_v52, %v137_v59 }
  0xe2   :  { %v1965_v62 = vpop.eup %1964 }
  0xe3   :  { %v1967_v1 = vpop.eup %1966  ;;  %v159_v3 = vadd.f32 %v1524_v54, %v148_v61  ;;  %v139_v4 = vmul.f32 %v1965_v62, %v127_v60 }
  0xe4   :  { %v138_v5 = vmul.f32 %v1967_v1, %v126_v63 }
  0xe5   :  { %1656 = vmatmul.mubr.msk.f32.vlgmr.msra.gmra.mrb[0].mxu0 %vm78_vm0, %v159_v3  ;;  %v150_v6 = vmul.f32 %v1523_v52, %v139_v4 }
  0xe6   :  { %v149_v2 = vmul.f32 %v1523_v52, %v138_v5 }
  0xe7   :  { %v161_v7 = vadd.f32 %v1524_v54, %v150_v6 }
  0xe8   :  { %v160_v8 = vadd.f32 %v1524_v54, %v149_v2 }
  0xea   :  { %1658 = vmatprep.mubr.msk.f32.mxu0 %vm78_vm0, %v160_v8 }
  0xeb   :  { %1659 = vmatmul.mubr.msk.f32.gmra.mrb[2].mxu0 %vm78_vm0, %v161_v7 }
  0xec   :  { %1683 = vmatprep.mubr.msk.f32.mxu0 %vm78_vm0, %v397_v36  ;;  %v672_v36 = vld [vmem:[#allocation6 + $0x68] sm:$0xff] }
 0x1b8   :  { %v1657_v10 = vpop.f32.mrb[0].mxu0 }
 0x1b9   :  { %v257_v9 = vadd.f32 %v1657_v10, %v1525_v0  ;;  %v251_v11 = vpop.f32.mrb[1].mxu0 }
 0x1ba   :  { %v252_v12 = vadd.f32 %v1525_v0, %v251_v11  ;;  %v537_v11 = vld [vmem:[#allocation6 + $0x48] sm:$0xff] }
 0x1bb   :  { %v275_v13 = vmul.f32 0.70710677, %v257_v9  ;;  %v271_v24 = vmul.f32 0.5, %v257_v9 }
 0x1bc   :  { %v274_v14 = vmul.f32 0.70710677, %v252_v12  ;;  %v270_v26 = vmul.f32 0.5, %v252_v12 }
 0x1bd   :  { %1968 = verf.f32 %v275_v13 }
 0x1be   :  { %1970 = verf.f32 %v274_v14  ;;  %v1660_v15 = vpop.f32.mrb[2].mxu0 }
 0x1bf   :  { %v267_v16 = vadd.f32 %v1660_v15, %v1525_v0  ;;  %v261_v17 = vpop.f32.mrb[3].mxu0 }
 0x1c0   :  { %v262_v18 = vadd.f32 %v1525_v0, %v261_v17  ;;  %v398_v0 = vld [vmem:[#allocation6 + $0x28] sm:$0xff] }
 0x1c1   :  { %v277_v19 = vmul.f32 0.70710677, %v267_v16  ;;  %v273_v34 = vmul.f32 0.5, %v267_v16 }
 0x1c2   :  { %v276_v20 = vmul.f32 0.70710677, %v262_v18  ;;  %v272_v37 = vmul.f32 0.5, %v262_v18  ;;  %v399_v18 = vld [vmem:[#allocation6 + $0x30] sm:$0xff] }
 0x1c3   :  { %1972 = verf.f32 %v277_v19  ;;  %v538_v19 = vld [vmem:[#allocation6 + $0x50] sm:$0xff] }
 0x1c4   :  { %1974 = verf.f32 %v276_v20 }
 0x1c7   :  { %v1969_v22 = vpop.eup %1968 }
 0x1c8   :  { %v1971_v23 = vpop.eup %1970  ;;  %v283_v25 = vadd.f32 1.0, %v1969_v22  ;;  %v400_v22 = vld [vmem:[#allocation6 + $0x38] sm:$0xff] }
 0x1c9   :  { %v282_v27 = vadd.f32 1.0, %v1971_v23  ;;  %v539_v23 = vld [vmem:[#allocation6 + $0x58] sm:$0xff] }
 0x1ca   :  { %v2251_v28 = vmul.f32 %v283_v25, %v271_v24 }
 0x1cb   :  { %v2253_v29 = vmul.f32 %v282_v27, %v270_v26 }
 0x1cd   :  { %v1973_v30 = vpop.eup %1972  ;;  %v1893_v31 = vpack.i.bf16 %v2251_v28, %v2253_v29  ;;  %v1795_v32 = vpack.c.bf16 %v2251_v28, %v2253_v29 }
 0x1ce   :  { %v1975_v33 = vpop.eup %1974  ;;  %v285_v35 = vadd.f32 1.0, %v1973_v30 }
 0x1cf   :  { %v284_v38 = vadd.f32 1.0, %v1975_v33  ;;  %1894 = vrot.lane.b32.xlu1 %v1893_v31, %s2075_s4  ;;  %1889 = vrot.lane.b32.xlu0 %v1893_v31, %s2076_s15  ;;  %v806_v33 = vld [vmem:[#allocation6 + $0x80] sm:$0xff] }
 0x1d0   :  { %v2259_v39 = vmul.f32 %v285_v35, %v273_v34  ;;  %1796 = vmatprep.subr.bf16.mxu1 %v1795_v32 }
 0x1d1   :  { %v2262_v40 = vmul.f32 %v284_v38, %v272_v37  ;;  %1798 = vmatpush3.bf16.msra.mxu1 %v1795_v32  ;;  %v671_v32 = vld [vmem:[#allocation6 + $0x60] sm:$0xff]  ;;  %v807_v37 = vld [vmem:[#allocation6 + $0x88] sm:$0xff] }
 0x1d3   :  { %v1908_v41 = vpack.i.bf16 %v2259_v39, %v2262_v40  ;;  %v1799_v42 = vpack.c.bf16 %v2259_v39, %v2262_v40 }
 0x1d5   :  { %1909 = vrot.lane.b32.xlu0 %v1908_v41, %s2075_s4  ;;  %1899 = vrot.lane.b32.xlu1 %v1908_v41, %s2076_s15 }
 0x1d6   :  { %1800 = vmatprep.subr.bf16.mxu1 %v1799_v42 }
 0x1d7   :  { %1802 = vmatpush3.bf16.msra.mxu1 %v1799_v42 }
 0x1d9   :  { %1914 = vrot.lane.b32.xlu0 %v1893_v31, %s2077_s16  ;;  %1904 = vrot.lane.b32.xlu1 %v1893_v31, %s2078_s17 }
 0x1da   :  { %1670 = vmatmul.mubr.msk.f32.vlgmr.msra.gmra.mrb[0].mxu1 %vm78_vm0, %v291_v43 }
 0x1db   :  { %1672 = vmatprep.mubr.msk.f32.mxu1 %vm78_vm0, %v292_v44 }
 0x1dd   :  { %1929 = vrot.lane.b32.xlu0 %v1908_v41, %s2077_s16  ;;  %1919 = vrot.lane.b32.xlu1 %v1908_v41, %s2078_s17 }
 0x1de   :  { %1673 = vmatmul.mubr.msk.f32.gmra.mrb[2].mxu1 %vm78_vm0, %v293_v45 }
 0x1df   :  { %1697 = vmatprep.mubr.msk.f32.mxu1 %vm78_vm0, %v536_v46  ;;  %v673_v46 = vld [vmem:[#allocation6 + $0x70] sm:$0xff] }
 0x1e1   :  { %1934 = vrot.lane.b32.xlu0 %v1893_v31, %s2079_s18  ;;  %1924 = vrot.lane.b32.xlu1 %v1893_v31, %s2080_s19 }
 0x1e5   :  { %1949 = vrot.lane.b32.xlu0 %v1908_v41, %s2079_s18  ;;  %1939 = vrot.lane.b32.xlu1 %v1908_v41, %s2080_s19 }
 0x1e9   :  { %1944 = vrot.lane.b32.xlu1 %v1893_v31, %s2081_s20  ;;  %1360 = vperm.xlu0 %1959, %v1350_v47   ;;  %v808_v47 = vld [vmem:[#allocation6 + $0x90] sm:$0xff] }
 0x1ed   :  { %1954 = vrot.lane.b32.xlu1 %v1908_v41, %s2081_s20 }
 0x1f1   :  { %1355 = vperm.xlu1 %1958, %v1349_v49  }
 0x241   :  { %v1895_v50 = vpop.permute.xlu1 %1894  ;;  %v1890_v51 = vpop.permute.xlu0 %1889 }
 0x242   :  { %v1897_v52 = vunpack.i.h.bf16 %v1895_v50  ;;  %v1896_v53 = vunpack.i.l.bf16 %v1895_v50  ;;  %v1892_v54 = vunpack.i.h.bf16 %v1890_v51  ;;  %v1891_v55 = vunpack.i.l.bf16 %v1890_v51  ;;  %v674_v50 = vld [vmem:[#allocation6 + $0x78] sm:$0xff] }
 0x243   :  { %v809_v51 = vld [vmem:[#allocation6 + $0x98] sm:$0xff] }
 0x244   :  { %v1811_v56 = vpack.c.bf16 %v1897_v52, %v1896_v53  ;;  %v1803_v57 = vpack.c.bf16 %v1892_v54, %v1891_v55  ;;  %v941_v55 = vld [vmem:[#allocation6 + $0xa0] sm:$0xff] }
 0x246   :  { %1812 = vmatprep.subr.bf16.mxu1 %v1811_v56  ;;  %1804 = vmatprep.subr.bf16.mxu0 %v1803_v57 }
 0x247   :  { %v1900_v58 = vpop.permute.xlu1 %1899  ;;  %v1910_v59 = vpop.permute.xlu0 %1909  ;;  %1806 = vmatpush3.bf16.msra.mxu0 %v1803_v57  ;;  %1814 = vmatpush3.bf16.msra.mxu1 %v1811_v56  ;;  %v1076_v56 = vld [vmem:[#allocation6 + $0xc0] sm:$0xff] }
 0x248   :  { %v1902_v60 = vunpack.i.h.bf16 %v1900_v58  ;;  %v1901_v61 = vunpack.i.l.bf16 %v1900_v58  ;;  %v1912_v62 = vunpack.i.h.bf16 %v1910_v59  ;;  %v1911_v63 = vunpack.i.l.bf16 %v1910_v59  ;;  %v942_v58 = vld [vmem:[#allocation6 + $0xa8] sm:$0xff] }
 0x249   :  { %v1077_v59 = vld [vmem:[#allocation6 + $0xc8] sm:$0xff] }
 0x24a   :  { %v1807_v1 = vpack.c.bf16 %v1902_v60, %v1901_v61  ;;  %v1815_v3 = vpack.c.bf16 %v1912_v62, %v1911_v63  ;;  %v943_v61 = vld [vmem:[#allocation6 + $0xb0] sm:$0xff] }
 0x24b   :  { %v1905_v4 = vpop.permute.xlu1 %1904  ;;  %v1915_v5 = vpop.permute.xlu0 %1914 }
 0x24c   :  { %v1907_v6 = vunpack.i.h.bf16 %v1905_v4  ;;  %v1906_v2 = vunpack.i.l.bf16 %v1905_v4  ;;  %v1917_v7 = vunpack.i.h.bf16 %v1915_v5  ;;  %v1916_v8 = vunpack.i.l.bf16 %v1915_v5  ;;  %1808 = vmatprep.subr.bf16.mxu0 %v1807_v1  ;;  %1816 = vmatprep.subr.bf16.mxu1 %v1815_v3  ;;  %v944_v4 = vld [vmem:[#allocation6 + $0xb8] sm:$0xff] }
 0x24d   :  { %1810 = vmatpush3.bf16.msra.mxu0 %v1807_v1  ;;  %1818 = vmatpush3.bf16.msra.mxu1 %v1815_v3  ;;  %v1078_v1 = vld [vmem:[#allocation6 + $0xd0] sm:$0xff]  ;;  %v1079_v5 = vld [vmem:[#allocation6 + $0xd8] sm:$0xff] }
 0x24e   :  { %v1819_v10 = vpack.c.bf16 %v1907_v6, %v1906_v2  ;;  %v1827_v9 = vpack.c.bf16 %v1917_v7, %v1916_v8  ;;  %v1211_v6 = vld [vmem:[#allocation6 + $0xe0] sm:$0xff]  ;;  %v1212_v2 = vld [vmem:[#allocation6 + $0xe8] sm:$0xff]  ;;  %v1213_v7 = vld [vmem:[#allocation6 + $0xf0] sm:$0xff] }
 0x24f   :  { %v1920_v12 = vpop.permute.xlu1 %1919  ;;  %v1930_v13 = vpop.permute.xlu0 %1929  ;;  %v1214_v8 = vld [vmem:[#allocation6 + $0xf8] sm:$0xff] }
 0x250   :  { %v1922_v14 = vunpack.i.h.bf16 %v1920_v12  ;;  %v1921_v15 = vunpack.i.l.bf16 %v1920_v12  ;;  %v1932_v16 = vunpack.i.h.bf16 %v1930_v13  ;;  %v1931_v17 = vunpack.i.l.bf16 %v1930_v13  ;;  %1684 = vmatmul.mubr.msk.f32.vlgmr.msra.gmra.mrb[4].mxu0 %vm78_vm0, %v398_v0  ;;  %1820 = vmatprep.subr.bf16.mxu0 %v1819_v10 }
 0x251   :  { %1828 = vmatprep.subr.bf16.mxu1 %v1827_v9  ;;  %1698 = vmatmul.mubr.msk.f32.vlgmr.msra.gmra.mrb[4].mxu1 %vm78_vm0, %v537_v11 }
 0x252   :  { %v1823_v20 = vpack.c.bf16 %v1922_v14, %v1921_v15  ;;  %v1831_v21 = vpack.c.bf16 %v1932_v16, %v1931_v17  ;;  %1822 = vmatpush3.bf16.msra.mxu0 %v1819_v10  ;;  %1830 = vmatpush3.bf16.msra.mxu1 %v1827_v9 }
 0x253   :  { %v1925_v24 = vpop.permute.xlu1 %1924  ;;  %v1935_v25 = vpop.permute.xlu0 %1934  ;;  %1686 = vmatprep.mubr.msk.f32.mxu0 %vm78_vm0, %v399_v18  ;;  %1700 = vmatprep.mubr.msk.f32.mxu1 %vm78_vm0, %v538_v19 }
 0x254   :  { %v1927_v26 = vunpack.i.h.bf16 %v1925_v24  ;;  %v1926_v27 = vunpack.i.l.bf16 %v1925_v24  ;;  %v1937_v30 = vunpack.i.h.bf16 %v1935_v25  ;;  %v1936_v31 = vunpack.i.l.bf16 %v1935_v25  ;;  %1824 = vmatprep.subr.bf16.mxu0 %v1823_v20  ;;  %1832 = vmatprep.subr.bf16.mxu1 %v1831_v21 }
 0x255   :  { %1687 = vmatmul.mubr.msk.f32.gmra.mrb[6].mxu0 %vm78_vm0, %v400_v22  ;;  %1701 = vmatmul.mubr.msk.f32.gmra.mrb[6].mxu1 %vm78_vm0, %v539_v23 }
 0x256   :  { %v1835_v34 = vpack.c.bf16 %v1927_v26, %v1926_v27  ;;  %v1843_v35 = vpack.c.bf16 %v1937_v30, %v1936_v31  ;;  %1826 = vmatpush3.bf16.msra.mxu0 %v1823_v20  ;;  %1834 = vmatpush3.bf16.msra.mxu1 %v1831_v21 }
 0x257   :  { %v1940_v38 = vpop.permute.xlu1 %1939  ;;  %v1950_v41 = vpop.permute.xlu0 %1949  ;;  %1711 = vmatprep.mubr.msk.f32.mxu0 %vm78_vm0, %v671_v32  ;;  %1725 = vmatprep.mubr.msk.f32.mxu1 %vm78_vm0, %v806_v33 }
 0x258   :  { %v1942_v42 = vunpack.i.h.bf16 %v1940_v38  ;;  %v1941_v43 = vunpack.i.l.bf16 %v1940_v38  ;;  %v1952_v44 = vunpack.i.h.bf16 %v1950_v41  ;;  %v1951_v45 = vunpack.i.l.bf16 %v1950_v41  ;;  %1836 = vmatprep.subr.bf16.mxu0 %v1835_v34  ;;  %1844 = vmatprep.subr.bf16.mxu1 %v1843_v35 }
 0x259   :  { %1712 = vmatmul.mubr.msk.f32.vlgmr.msra.gmra.mrb[8].mxu0 %vm78_vm0, %v672_v36  ;;  %1726 = vmatmul.mubr.msk.f32.vlgmr.msra.gmra.mrb[8].mxu1 %vm78_vm0, %v807_v37 }
 0x25a   :  { %v1839_v48 = vpack.c.bf16 %v1942_v42, %v1941_v43  ;;  %v1847_v49 = vpack.c.bf16 %v1952_v44, %v1951_v45  ;;  %1838 = vmatpush3.bf16.msra.mxu0 %v1835_v34  ;;  %1846 = vmatpush3.bf16.msra.mxu1 %v1843_v35  ;;  %v1393_v44 = vld [vmem:[#allocation8] sm:$0xff]  ;;  %v1394_v45 = vld [vmem:[#allocation8 + $0x8] sm:$0xff] }
 0x25b   :  { %v1945_v52 = vpop.permute.xlu1 %1944  ;;  %1714 = vmatprep.mubr.msk.f32.mxu0 %vm78_vm0, %v673_v46  ;;  %1728 = vmatprep.mubr.msk.f32.mxu1 %vm78_vm0, %v808_v47  ;;  %v1859_v46 = vpack.c.bf16 %v1394_v45, %v1393_v44  ;;  %v1351_v47 = vld [vmem:[%s2368_s6 + $0x10] sm:$0xff] }
 0x25c   :  { %v1947_v53 = vunpack.i.h.bf16 %v1945_v52  ;;  %v1946_v54 = vunpack.i.l.bf16 %v1945_v52  ;;  %1840 = vmatprep.subr.bf16.mxu0 %v1839_v48  ;;  %1848 = vmatprep.subr.bf16.mxu1 %v1847_v49 }
 0x25d   :  { %1715 = vmatmul.mubr.msk.f32.gmra.mrb[10].mxu0 %vm78_vm0, %v674_v50  ;;  %1729 = vmatmul.mubr.msk.f32.gmra.mrb[10].mxu1 %vm78_vm0, %v809_v51  ;;  %v1396_v50 = vld [vmem:[#allocation8 + $0x18] sm:$0xff] }
 0x25e   :  { %v1851_v57 = vpack.c.bf16 %v1947_v53, %v1946_v54  ;;  %1842 = vmatpush3.bf16.msra.mxu0 %v1839_v48  ;;  %1850 = vmatpush3.bf16.msra.mxu1 %v1847_v49  ;;  %v1352_v48 = vld [vmem:[%s2368_s6 + $0x18] sm:$0xff]  ;;  %v1395_v49 = vld [vmem:[#allocation8 + $0x10] sm:$0xff] }
 0x25f   :  { %v1955_v60 = vpop.permute.xlu1 %1954  ;;  %1739 = vmatprep.mubr.msk.f32.mxu0 %vm78_vm0, %v941_v55  ;;  %1753 = vmatprep.mubr.msk.f32.mxu1 %vm78_vm0, %v1076_v56  ;;  %v1863_v51 = vpack.c.bf16 %v1396_v50, %v1395_v49 }
 0x260   :  { %v1957_v62 = vunpack.i.h.bf16 %v1955_v60  ;;  %v1956_v63 = vunpack.i.l.bf16 %v1955_v60  ;;  %1852 = vmatprep.subr.bf16.mxu0 %v1851_v57  ;;  %1860 = vmatprep.subr.bf16.mxu1 %v1859_v46 }
 0x261   :  { %1740 = vmatmul.mubr.msk.f32.vlgmr.msra.gmra.mrb[12].mxu0 %vm78_vm0, %v942_v58  ;;  %1754 = vmatmul.mubr.msk.f32.vlgmr.msra.gmra.mrb[12].mxu1 %vm78_vm0, %v1077_v59 }
 0x262   :  { %v1855_v3 = vpack.c.bf16 %v1957_v62, %v1956_v63  ;;  %1854 = vmatpush3.bf16.msra.mxu0 %v1851_v57  ;;  %1742 = vmatprep.mubr.msk.f32.mxu0 %vm78_vm0, %v943_v61 }
 0x263   :  { %1756 = vmatprep.mubr.msk.f32.mxu1 %vm78_vm0, %v1078_v1  ;;  %1862 = vmatpush3.bf16.msra.mxu1 %v1859_v46 }
 0x264   :  { %1856 = vmatprep.subr.bf16.mxu0 %v1855_v3  ;;  %1864 = vmatprep.subr.bf16.mxu1 %v1863_v51 }
 0x265   :  { %1743 = vmatmul.mubr.msk.f32.gmra.mrb[14].mxu0 %vm78_vm0, %v944_v4  ;;  %1757 = vmatmul.mubr.msk.f32.gmra.mrb[14].mxu1 %vm78_vm0, %v1079_v5 }
 0x266   :  { %1858 = vmatpush3.bf16.msra.mxu0 %v1855_v3  ;;  %1767 = vmatprep.mubr.msk.f32.mxu0 %vm78_vm0, %v1211_v6 }
 0x267   :  { %1866 = vmatpush3.bf16.msra.mxu1 %v1863_v51 }
 0x268   :  { %v2320_v53 = vpop.permute.xlu0 %1360 }
 0x269   :  { %1768 = vmatmul.mubr.msk.f32.vlgmr.msra.gmra.mrb[16].mxu0 %vm78_vm0, %v1212_v2 }
 0x26a   :  { %1770 = vmatprep.mubr.msk.f32.mxu0 %vm78_vm0, %v1213_v7 }
 0x26d   :  { %1771 = vmatmul.mubr.msk.f32.gmra.mrb[18].mxu0 %vm78_vm0, %v1214_v8 }
 0x270   :  { %v2318_v52 = vpop.permute.xlu1 %1355 }
 0x2ad   :  { %v1671_v0 = vpop.f32.mrb[0].mxu1 }
 0x2ae   :  { %393 = vst.msk [vmem:[#allocation2 + $0x8] sm:$0xff] %vm391_vm1, %v1671_v0  ;;  %v372_v10 = vpop.f32.mrb[1].mxu1 }
 0x2af   :  { %392 = vst.msk [vmem:[#allocation2] sm:$0xff] %vm391_vm1, %v372_v10 }
 0x2b1   :  { %v1674_v9 = vpop.f32.mrb[2].mxu1 }
 0x2b2   :  { %395 = vst.msk [vmem:[#allocation2 + $0x18] sm:$0xff] %vm391_vm1, %v1674_v9  ;;  %v382_v11 = vpop.f32.mrb[3].mxu1 }
 0x2b3   :  { %394 = vst.msk [vmem:[#allocation2 + $0x10] sm:$0xff] %vm391_vm1, %v382_v11 }
 0x323   :  { %v1685_v12 = vpop.f32.mrb[4].mxu0 }
 0x324   :  { %520 = vrot.lane.b32.xlu1 %v1685_v12, %s2083_s12  ;;  %v495_v13 = vpop.f32.mrb[5].mxu0  ;;  %v1699_v14 = vpop.f32.mrb[4].mxu1 }
 0x325   :  { %518 = vrot.lane.b32.xlu0 %v495_v13, %s2083_s12  ;;  %v630_v15 = vpop.f32.mrb[5].mxu1 }
 0x328   :  { %655 = vrot.lane.b32.xlu1 %v1699_v14, %s2073_s22  ;;  %v1688_v16 = vpop.f32.mrb[6].mxu0  ;;  %v1702_v17 = vpop.f32.mrb[6].mxu1 }
 0x329   :  { %653 = vrot.lane.b32.xlu0 %v630_v15, %s2073_s22  ;;  %v505_v18 = vpop.f32.mrb[7].mxu0  ;;  %v640_v19 = vpop.f32.mrb[7].mxu1 }
 0x32c   :  { %522 = vrot.lane.b32.xlu1 %v505_v18, %s2083_s12  ;;  %v1713_v20 = vpop.f32.mrb[8].mxu0  ;;  %v1727_v21 = vpop.f32.mrb[8].mxu1 }
 0x32d   :  { %524 = vrot.lane.b32.xlu0 %v1688_v16, %s2083_s12  ;;  %v765_v22 = vpop.f32.mrb[9].mxu0  ;;  %v900_v23 = vpop.f32.mrb[9].mxu1 }
 0x330   :  { %657 = vrot.lane.b32.xlu1 %v640_v19, %s2073_s22  ;;  %v1716_v24 = vpop.f32.mrb[10].mxu0  ;;  %v1730_v25 = vpop.f32.mrb[10].mxu1 }
 0x331   :  { %659 = vrot.lane.b32.xlu0 %v1702_v17, %s2073_s22  ;;  %v775_v26 = vpop.f32.mrb[11].mxu0  ;;  %v910_v27 = vpop.f32.mrb[11].mxu1 }
 0x334   :  { %790 = vrot.lane.b32.xlu1 %v1713_v20, %s2084_s26  ;;  %v1741_v30 = vpop.f32.mrb[12].mxu0  ;;  %v1755_v31 = vpop.f32.mrb[12].mxu1 }
 0x335   :  { %925 = vrot.lane.b32.xlu0 %v1727_v21, %s2085_s27  ;;  %v1035_v32 = vpop.f32.mrb[13].mxu0  ;;  %v1170_v33 = vpop.f32.mrb[13].mxu1 }
 0x338   :  { %792 = vrot.lane.b32.xlu1 %v775_v26, %s2084_s26  ;;  %v1744_v34 = vpop.f32.mrb[14].mxu0  ;;  %v1758_v35 = vpop.f32.mrb[14].mxu1 }
 0x339   :  { %788 = vrot.lane.b32.xlu0 %v765_v22, %s2084_s26  ;;  %v1045_v36 = vpop.f32.mrb[15].mxu0  ;;  %v1180_v37 = vpop.f32.mrb[15].mxu1 }
 0x33c   :  { %927 = vrot.lane.b32.xlu1 %v910_v27, %s2085_s27  ;;  %v1769_v38 = vpop.f32.mrb[16].mxu0 }
 0x33d   :  { %923 = vrot.lane.b32.xlu0 %v900_v23, %s2085_s27  ;;  %v1305_v41 = vpop.f32.mrb[17].mxu0 }
 0x340   :  { %1058 = vrot.lane.b32.xlu1 %v1035_v32, %s2086_s28  ;;  %v1772_v42 = vpop.f32.mrb[18].mxu0 }
 0x341   :  { %794 = vrot.lane.b32.xlu0 %v1716_v24, %s2084_s26  ;;  %v1315_v43 = vpop.f32.mrb[19].mxu0 }
 0x344   :  { %1193 = vrot.lane.b32.xlu1 %v1170_v33, %s2087_s29 }
 0x345   :  { %929 = vrot.lane.b32.xlu0 %v1730_v25, %s2085_s27 }
 0x348   :  { %1064 = vrot.lane.b32.xlu1 %v1744_v34, %s2086_s28  ;;  %v1562_v34 = vld [vmem:[%s2370_s8] ss:$0 sm:$0xff]  ;;  %s2042_s8 = scalar_lea.vmem %s1511_s1, 512 }
 0x349   :  { %1060 = vrot.lane.b32.xlu0 %v1741_v30, %s2086_s28  ;;  %p2043_p10 = scmp.ne.s32.totalorder %s1511_s1, %s2042_s8  ;;  %p2048_p12 = scmp.lt.s32.totalorder %s2042_s8, %s2042_s8 }
 0x34b   :  { %p2049_p13 = por %p2048_p12, %p2047_p11 }
 0x34c   :  { %1062 = vrot.lane.b32.xlu1 %v1045_v36, %s2086_s28 }
 0x34d   :  { %1195 = vrot.lane.b32.xlu0 %v1755_v31, %s2087_s29  ;;  %p2050_p0 = pnand %p2049_p13, %p2043_p10 }
 0x350   :  { %1197 = vrot.lane.b32.xlu1 %v1180_v37, %s2087_s29 }
 0x351   :  { %1199 = vrot.lane.b32.xlu0 %v1758_v35, %s2087_s29 }
 0x354   :  { %1328 = vrot.lane.b32.xlu1 %v1305_v41, %s2088_s30 }
 0x355   :  { %1330 = vrot.lane.b32.xlu0 %v1769_v38, %s2088_s30 }
 0x358   :  { %1332 = vrot.lane.b32.xlu1 %v1315_v43, %s2088_s30 }
 0x359   :  { %1334 = vrot.lane.b32.xlu0 %v1772_v42, %s2088_s30 }
 0x35c   :  { %1365 = vperm.xlu1 %1958, %v1351_v47  }
 0x35d   :  { %1370 = vperm.xlu0 %1959, %v1352_v48  }
 0x360   :  { %1377 = vrot.lane.b32.xlu1 %v2253_v29, %s2089_s5 }
 0x361   :  { %1379 = vrot.lane.b32.xlu0 %v2251_v28, %s2089_s5 }
 0x364   :  { %1381 = vrot.lane.b32.xlu1 %v2262_v40, %s2089_s5 }
 0x365   :  { %1383 = vrot.lane.b32.xlu0 %v2259_v39, %s2089_s5 }
 0x396   :  { %v521_v54 = vpop.permute.xlu1 %520 }
 0x397   :  { %532 = vst.msk [vmem:[#allocation2 + $0x8] sm:$0xff] %vm530_vm2, %v521_v54  ;;  %v519_v55 = vpop.permute.xlu0 %518 }
 0x398   :  { %531 = vst.msk [vmem:[#allocation2] sm:$0xff] %vm530_vm2, %v519_v55 }
 0x39a   :  { %v656_v56 = vpop.permute.xlu1 %655 }
 0x39b   :  { %667 = vst.msk [vmem:[#allocation2 + $0x8] sm:$0xff] %vm665_vm3, %v656_v56  ;;  %v654_v29 = vpop.permute.xlu0 %653 }
 0x39c   :  { %666 = vst.msk [vmem:[#allocation2] sm:$0xff] %vm665_vm3, %v654_v29 }
 0x39e   :  { %v523_v28 = vpop.permute.xlu1 %522 }
 0x39f   :  { %533 = vst.msk [vmem:[#allocation2 + $0x10] sm:$0xff] %vm530_vm2, %v523_v28  ;;  %v525_v57 = vpop.permute.xlu0 %524 }
 0x3a0   :  { %534 = vst.msk [vmem:[#allocation2 + $0x18] sm:$0xff] %vm530_vm2, %v525_v57 }
 0x3a2   :  { %v658_v40 = vpop.permute.xlu1 %657 }
 0x3a3   :  { %668 = vst.msk [vmem:[#allocation2 + $0x10] sm:$0xff] %vm665_vm3, %v658_v40  ;;  %v660_v39 = vpop.permute.xlu0 %659 }
 0x3a4   :  { %669 = vst.msk [vmem:[#allocation2 + $0x18] sm:$0xff] %vm665_vm3, %v660_v39 }
 0x3a6   :  { %v791_v58 = vpop.permute.xlu1 %790 }
 0x3a7   :  { %802 = vst.msk [vmem:[#allocation2 + $0x8] sm:$0xff] %vm800_vm4, %v791_v58  ;;  %v926_v59 = vpop.permute.xlu0 %925 }
 0x3a8   :  { %937 = vst.msk [vmem:[#allocation2 + $0x8] sm:$0xff] %vm935_vm5, %v926_v59 }
 0x3aa   :  { %v793_v60 = vpop.permute.xlu1 %792 }
 0x3ab   :  { %803 = vst.msk [vmem:[#allocation2 + $0x10] sm:$0xff] %vm800_vm4, %v793_v60  ;;  %v789_v61 = vpop.permute.xlu0 %788 }
 0x3ac   :  { %801 = vst.msk [vmem:[#allocation2] sm:$0xff] %vm800_vm4, %v789_v61 }
 0x3ae   :  { %v928_v62 = vpop.permute.xlu1 %927 }
 0x3af   :  { %938 = vst.msk [vmem:[#allocation2 + $0x10] sm:$0xff] %vm935_vm5, %v928_v62  ;;  %v924_v63 = vpop.permute.xlu0 %923 }
 0x3b0   :  { %936 = vst.msk [vmem:[#allocation2] sm:$0xff] %vm935_vm5, %v924_v63 }
 0x3b2   :  { %v1059_v1 = vpop.permute.xlu1 %1058 }
 0x3b3   :  { %1071 = vst.msk [vmem:[#allocation2] sm:$0xff] %vm1070_vm6, %v1059_v1  ;;  %v795_v3 = vpop.permute.xlu0 %794 }
 0x3b4   :  { %804 = vst.msk [vmem:[#allocation2 + $0x18] sm:$0xff] %vm800_vm4, %v795_v3 }
 0x3b6   :  { %v1194_v4 = vpop.permute.xlu1 %1193 }
 0x3b7   :  { %1206 = vst.msk [vmem:[#allocation2] sm:$0xff] %vm1205_vm7, %v1194_v4  ;;  %v930_v5 = vpop.permute.xlu0 %929 }
 0x3b8   :  { %939 = vst.msk [vmem:[#allocation2 + $0x18] sm:$0xff] %vm935_vm5, %v930_v5 }
 0x3ba   :  { %v1065_v6 = vpop.permute.xlu1 %1064 }
 0x3bb   :  { %1074 = vst.msk [vmem:[#allocation2 + $0x18] sm:$0xff] %vm1070_vm6, %v1065_v6  ;;  %v1061_v2 = vpop.permute.xlu0 %1060 }
 0x3bc   :  { %1072 = vst.msk [vmem:[#allocation2 + $0x8] sm:$0xff] %vm1070_vm6, %v1061_v2 }
 0x3be   :  { %v1063_v7 = vpop.permute.xlu1 %1062 }
 0x3bf   :  { %1073 = vst.msk [vmem:[#allocation2 + $0x10] sm:$0xff] %vm1070_vm6, %v1063_v7  ;;  %v1196_v8 = vpop.permute.xlu0 %1195 }
 0x3c0   :  { %1207 = vst.msk [vmem:[#allocation2 + $0x8] sm:$0xff] %vm1205_vm7, %v1196_v8 }
 0x3c2   :  { %v1198_v0 = vpop.permute.xlu1 %1197 }
 0x3c3   :  { %1208 = vst.msk [vmem:[#allocation2 + $0x10] sm:$0xff] %vm1205_vm7, %v1198_v0  ;;  %v1200_v10 = vpop.permute.xlu0 %1199 }
 0x3c4   :  { %1209 = vst.msk [vmem:[#allocation2 + $0x18] sm:$0xff] %vm1205_vm7, %v1200_v10 }
 0x3c6   :  { %v1329_v9 = vpop.permute.xlu1 %1328 }
 0x3c7   :  { %1341 = vst.msk [vmem:[#allocation2] sm:$0xff] %vm1340_vm8, %v1329_v9  ;;  %v1331_v11 = vpop.permute.xlu0 %1330 }
 0x3c8   :  { %1342 = vst.msk [vmem:[#allocation2 + $0x8] sm:$0xff] %vm1340_vm8, %v1331_v11 }
 0x3ca   :  { %v1333_v12 = vpop.permute.xlu1 %1332 }
 0x3cb   :  { %1343 = vst.msk [vmem:[#allocation2 + $0x10] sm:$0xff] %vm1340_vm8, %v1333_v12  ;;  %v1335_v13 = vpop.permute.xlu0 %1334 }
 0x3cc   :  { %1344 = vst.msk [vmem:[#allocation2 + $0x18] sm:$0xff] %vm1340_vm8, %v1335_v13 }
 0x3ce   :  { %v1345_v15 = vld [vmem:[#allocation2] sm:$0xff] }
 0x3cf   :  { %v1346_v17 = vld [vmem:[#allocation2 + $0x8] sm:$0xff]  ;;  %v1373_v18 = vadd.f32 %v2318_v52, %v1345_v15 }
 0x3d0   :  { %v1374_v20 = vadd.f32 %v2320_v53, %v1346_v17 }
 0x3d2   :  { %v1347_v23 = vld [vmem:[#allocation2 + $0x10] sm:$0xff] }
 0x3d3   :  { %v1348_v26 = vld [vmem:[#allocation2 + $0x18] sm:$0xff] }
 0x3db   :  { %v1366_v14 = vpop.permute.xlu1 %1365 }
 0x3dc   :  { %v1371_v16 = vpop.permute.xlu0 %1370  ;;  %v1375_v25 = vadd.f32 %v1366_v14, %v1347_v23 }
 0x3dd   :  { %v1376_v27 = vadd.f32 %v1371_v16, %v1348_v26 }
 0x3df   :  { %v1378_v19 = vpop.permute.xlu1 %1377 }
 0x3e0   :  { %v1389_v21 = vmul.f32 %v1378_v19, %v1373_v18  ;;  %v1380_v22 = vpop.permute.xlu0 %1379 }
 0x3e1   :  { %v1390_v24 = vmul.f32 %v1380_v22, %v1374_v20 }
 0x3e2   :  { %1781 = vmatprep.mubr.msk.f32.mxu1 %vm78_vm0, %v1389_v21 }
 0x3e3   :  { %1782 = vmatmul.mubr.msk.f32.vlgmr.msra.gmra.mrb[16].mxu1 %vm78_vm0, %v1390_v24  ;;  %v1382_v30 = vpop.permute.xlu1 %1381 }
 0x3e4   :  { %v1391_v31 = vmul.f32 %v1382_v30, %v1375_v25  ;;  %v1384_v32 = vpop.permute.xlu0 %1383 }
 0x3e5   :  { %v1392_v33 = vmul.f32 %v1384_v32, %v1376_v27 }
 0x3e6   :  { %1784 = vmatprep.mubr.msk.f32.mxu1 %vm78_vm0, %v1391_v31 }
 0x3e7   :  { %1785 = vmatmul.mubr.msk.f32.gmra.mrb[18].mxu1 %vm78_vm0, %v1392_v33 }
 0x4b6   :  { %v1783_v35 = vpop.f32.mrb[16].mxu1 }
 0x4b7   :  { %v1488_v36 = vadd.f32 %v1783_v35, %v1562_v34  ;;  %v1482_v37 = vpop.f32.mrb[17].mxu1 }
 0x4b8   :  { %v1483_v38 = vadd.f32 %v1562_v34, %v1482_v37 }
 0x4b9   :  { %1502 = vst.msk [vmem:[#allocation9 + $0x8] sm:$0xff] %vm78_vm0, %v1488_v36 }
 0x4ba   :  { %1501 = vst.msk [vmem:[#allocation9] sm:$0xff] %vm78_vm0, %v1483_v38  ;;  %v1786_v41 = vpop.f32.mrb[18].mxu1 }
 0x4bb   :  { %v1498_v42 = vadd.f32 %v1786_v41, %v1562_v34  ;;  %v1492_v43 = vpop.f32.mrb[19].mxu1 }
 0x4bc   :  { %v1493_v44 = vadd.f32 %v1562_v34, %v1492_v43 }
 0x4bd   :  { %1504 = vst.msk [vmem:[#allocation9 + $0x18] sm:$0xff] %vm78_vm0, %v1498_v42 }
 0x4be   :  { %1503 = vst.msk [vmem:[#allocation9 + $0x10] sm:$0xff] %vm78_vm0, %v1493_v44 }
 0x4bf   :  { %2053 = shalt.err (!%p2050_p0)
}
 0x4c0   :  { %s2054_s15 = scalar_lea.hbm %s2371_s9, 512 }
 0x4c1   :  { %p2055_p1 = scmp.ne.s32.totalorder %s2371_s9, %s2054_s15  ;;  %p2058_p2 = scmp.lt.u32.totalorder %s2054_s15, %s2371_s9 }
 0x4c3   :  { %p2060_p3 = pnand %p2058_p2, %p2055_p1 }
 0x4c5   :  { %2063 = shalt.err (!%p2060_p3)
}
 0x4c6   :  { %1516 = dma.vmem_to_hbm [thread:$0]  %s1511_s1, 512, %s2371_s9, [#allocation5], %s2072_s21, %s2072_s21, %s2073_s22  }
 0x4c7   :  { %2068 = dma.done.wait [#allocation5], 512  }
 0x4c8   :  { %2069 = vsyncadd [#allocation5], 4294966784 }
 0x4c9   :  { %1520 = vsyncpa [#allocation4], 1 }
 0x4ca   :  { %1521 = vsyncpa [#allocation7], 1 }
 0x4cb   :  { %1522 = vsyncpa [#allocation5], 1 }

</bundles_post_ra>
